<compile_context>
chip_gen: v5e
topology: v5e:2x2
jax: 0.10.0
libtpu: 0.0.40
codegen_flags: <defaults>
</compile_context>

<pallas_src>
import jax
import jax.numpy as jnp
from jax.experimental import pallas as pl
from jax.experimental.pallas import tpu as pltpu

_DEFAULT_TILE_M = 1024                    # sweepable: 512 / 1024 / 2048
_VMEM_BUDGET_BYTES = 40 * 1024 * 1024     # comfortably inside v5e/v6e/v7x limits
_VMEM_LIMIT_BYTES = 64 * 1024 * 1024      # raise scoped VMEM limit above 16/32 MiB default


def _round_up(x: int, m: int) -> int:
    return ((x + m - 1) // m) * m


def _choose_tile_m(batch: int, in_dim: int, out_dim: int, tile_m: int, itemsize: int) -> int:
    # Keep at least 2 batch tiles so ("parallel",) can split work across TCs on v7x.
    tile_m = min(tile_m, _round_up(max((batch + 1) // 2, 8), 8))
    # Shrink until double-buffered x/out tiles + resident w/b fit the VMEM budget.
    while tile_m > 8:
        need = (2 * tile_m * in_dim + 2 * tile_m * out_dim) * itemsize \
               + (in_dim * out_dim + out_dim) * itemsize
        if need <= _VMEM_BUDGET_BYTES:
            break
        tile_m = max(_round_up(tile_m // 2, 8), 8)
    return max(tile_m, 8)


def _logreg_kernel(x_ref, w_ref, b_ref, out_ref):
    # x_ref: (tile_m, in_dim)   w_ref: (in_dim, out_dim)   b_ref: (1, out_dim)
    # bf16 operands go straight to the MXU; accumulation and softmax math in f32.
    logits = jnp.dot(x_ref[...], w_ref[...], preferred_element_type=jnp.float32)
    logits = logits + b_ref[...].astype(jnp.float32)
    # Numerically stable log_softmax over the feature (lane) axis.
    m = jnp.max(logits, axis=1, keepdims=True)
    z = logits - m
    lse = jnp.log(jnp.sum(jnp.exp(z), axis=1, keepdims=True))
    out_ref[...] = (z - lse).astype(out_ref.dtype)


def logistic_regression_forward(x, w, b, *, tile_m: int | None = None):
    """x: (batch, in_dim).  w: (in_dim, out_dim) (pre-transposed vs nn.Linear).  b: (out_dim,)."""
    batch, in_dim = x.shape
    out_dim = w.shape[1]

    if tile_m is None:
        tile_m = _DEFAULT_TILE_M
    tile_m = _choose_tile_m(batch, in_dim, out_dim, tile_m, x.dtype.itemsize)

    grid = (pl.cdiv(batch, tile_m),)
    b2 = b.reshape(1, out_dim)

    cost = pl.CostEstimate(
        flops=2 * batch * in_dim * out_dim,
        transcendentals=batch * (out_dim + 1),  # exp per logit + log per row
        bytes_accessed=(x.size * x.dtype.itemsize
                        + w.size * w.dtype.itemsize
                        + b.size * b.dtype.itemsize
                        + batch * out_dim * x.dtype.itemsize),
    )

    return pl.pallas_call(
        _logreg_kernel,
        out_shape=jax.ShapeDtypeStruct((batch, out_dim), x.dtype),
        grid=grid,
        in_specs=[
            # Activations: tiled over the batch axis, native (unpadded) feature width.
            pl.BlockSpec((tile_m, in_dim), lambda i: (i, 0)),
            # Weights / bias: whole-array, VMEM-resident, single copy (no double-buffer).
            pl.BlockSpec(memory_space=pltpu.MemorySpace.VMEM),
            pl.BlockSpec(memory_space=pltpu.MemorySpace.VMEM),
        ],
        out_specs=pl.BlockSpec((tile_m, out_dim), lambda i: (i, 0)),
        compiler_params=pltpu.CompilerParams(
            dimension_semantics=("parallel",),      # batch tiles shard across TCs (v7x)
            vmem_limit_bytes=_VMEM_LIMIT_BYTES,
        ),
        cost_estimate=cost,
    )(x, w, b2)


def init_params(key, input_dim, output_dim):
    """Mirrors nn.Linear default init; weight stored pre-transposed as (in, out)."""
    kw, kb = jax.random.split(key)
    bound = 1.0 / (input_dim ** 0.5)
    w = jax.random.uniform(kw, (input_dim, output_dim), jnp.float32, -bound, bound)
    b = jax.random.uniform(kb, (output_dim,), jnp.float32, -bound, bound)
    return w, b


def reference_forward(x, w, b):
    return jax.nn.log_softmax(x @ w + b, axis=1)


if __name__ == "__main__":
    # Small but non-trivial shapes: batch not a multiple of the tile, feature dims far
    # from 128, to exercise the partial-tail-block and unaligned K/N matmul paths.
    batch, input_dim, output_dim = 250, 30, 10

    key = jax.random.PRNGKey(0)
    key, kx, kp = jax.random.split(key, 3)
    x = jax.random.normal(kx, (batch, input_dim), jnp.float32)
    w, b = init_params(kp, input_dim, output_dim)

    fwd = jax.jit(logistic_regression_forward)
    out = jax.block_until_ready(fwd(x, w, b))

    ref = reference_forward(x, w, b)
    assert out.shape == (batch, output_dim)
    assert jnp.allclose(out, ref, atol=1e-5, rtol=1e-5), float(jnp.max(jnp.abs(out - ref)))
    # rows of exp(log_softmax) must sum to ~1
    assert jnp.allclose(jnp.sum(jnp.exp(out), axis=1), 1.0, atol=1e-4)

    # TODO(synk): the module's nll_loss / reset_parameters are training-time utilities,
    # not part of the forward pass, so they are not implemented as kernels.
    print("KERNEL_OK")
</pallas_src>

<mosaic_0001>
module attributes {stable_mosaic.version = 11 : i64} {
  func.func @_logreg_kernel(%arg0: i32, %arg1: memref<128x30xf32, #tpu.memory_space<vmem>>, %arg2: memref<30x10xf32, #tpu.memory_space<vmem>>, %arg3: memref<1x10xf32, #tpu.memory_space<vmem>>, %arg4: memref<128x10xf32, #tpu.memory_space<vmem>>) attributes {dimension_semantics = [#tpu.dimension_semantics<parallel>], iteration_bounds = array<i64: 2>, scalar_prefetch = 0 : i64, scratch_operands = 0 : i64, tpu.core_type = #tpu.core_type<tc>, window_params = [{transform_indices = @transform_0, window_bounds = array<i64: 128, 30>}, {pipeline_mode = #tpu.pipeline_mode<synchronous>, transform_indices = @transform_1, window_bounds = array<i64: 30, 10>}, {pipeline_mode = #tpu.pipeline_mode<synchronous>, transform_indices = @transform_2, window_bounds = array<i64: 1, 10>}, {transform_indices = @transform_3, window_bounds = array<i64: 128, 10>}]} {
    %c0 = arith.constant 0 : index
    %c0_0 = arith.constant 0 : index
    %0 = vector.load %arg1[%c0, %c0_0] : memref<128x30xf32, #tpu.memory_space<vmem>>, vector<128x30xf32>
    %c0_1 = arith.constant 0 : index
    %c0_2 = arith.constant 0 : index
    %1 = vector.load %arg2[%c0_1, %c0_2] : memref<30x10xf32, #tpu.memory_space<vmem>>, vector<30x10xf32>
    %cst = arith.constant dense<0.000000e+00> : vector<128x10xf32>
    %2 = tpu.matmul %0, %1, %cst {dimension_numbers = #tpu.dot_dimension_numbers<[1], [0], [0], [1], [0, 0, 1, 1], [], []>} : vector<128x30xf32>, vector<30x10xf32>, vector<128x10xf32> -> vector<128x10xf32>
    %c0_3 = arith.constant 0 : index
    %c0_4 = arith.constant 0 : index
    %3 = vector.load %arg3[%c0_3, %c0_4] : memref<1x10xf32, #tpu.memory_space<vmem>>, vector<1x10xf32>
    %4 = vector.broadcast %3 : vector<1x10xf32> to vector<128x10xf32>
    %5 = arith.addf %2, %4 : vector<128x10xf32>
    %cst_5 = arith.constant dense<0xFF800000> : vector<128xf32>
    %6 = vector.multi_reduction <maximumf>, %5, %cst_5 [1] : vector<128x10xf32> to vector<128xf32>
    %7 = vector.shape_cast %6 : vector<128xf32> to vector<128x1xf32>
    %8 = vector.broadcast %7 : vector<128x1xf32> to vector<128x10xf32>
    %9 = arith.subf %5, %8 : vector<128x10xf32>
    %10 = math.exp %9 : vector<128x10xf32>
    %cst_6 = arith.constant dense<0.000000e+00> : vector<128xf32>
    %11 = vector.multi_reduction <add>, %10, %cst_6 [1] : vector<128x10xf32> to vector<128xf32>
    %12 = vector.shape_cast %11 : vector<128xf32> to vector<128x1xf32>
    %13 = math.log %12 : vector<128x1xf32>
    %14 = vector.broadcast %13 : vector<128x1xf32> to vector<128x10xf32>
    %15 = arith.subf %9, %14 : vector<128x10xf32>
    %c0_7 = arith.constant 0 : index
    %c0_8 = arith.constant 0 : index
    %16 = vector.load %arg4[%c0_7, %c0_8] : memref<128x10xf32, #tpu.memory_space<vmem>>, vector<128x10xf32>
    tpu.vector_store %arg4[%c0_7, %c0_8], %15 {strides = array<i32>} : memref<128x10xf32, #tpu.memory_space<vmem>>, vector<128x10xf32>,
    return
  }
  func.func @transform_0(%arg0: i32) -> (i32, i32) {
    %c0_i32 = arith.constant 0 : i32
    %c0_i32_0 = arith.constant 0 : i32
    return %arg0, %c0_i32 : i32, i32
  }
  func.func @transform_1(%arg0: i32) -> (i32, i32) {
    %c0_i32 = arith.constant 0 : i32
    %c0_i32_0 = arith.constant 0 : i32
    %c0_i32_1 = arith.constant 0 : i32
    return %c0_i32, %c0_i32_0 : i32, i32
  }
  func.func @transform_2(%arg0: i32) -> (i32, i32) {
    %c0_i32 = arith.constant 0 : i32
    %c0_i32_0 = arith.constant 0 : i32
    %c0_i32_1 = arith.constant 0 : i32
    return %c0_i32, %c0_i32_0 : i32, i32
  }
  func.func @transform_3(%arg0: i32) -> (i32, i32) {
    %c0_i32 = arith.constant 0 : i32
    %c0_i32_0 = arith.constant 0 : i32
    return %arg0, %c0_i32 : i32, i32
  }
}

</mosaic_0001>

<bundles_post_ra>
// kernel: logistic_regression_forward.1
= control target key start
LH: loop header
LB: loop body
LE: loop exit
PB: predicated region body
PF: predicated region fallthrough
CT: control target
= control target key end

     0   :  { %s722_s12 = smov 0   ;;  %s1007_s0 = inlined_call_operand.vmem [shape: f32[250,30], index: 0, kind: input, shape index: {}]   ;;  %s1008_s1 = inlined_call_operand.vmem [shape: f32[30,10], index: 1, kind: input, shape index: {}]   ;;  %s1009_s2 = inlined_call_operand.vmem [shape: f32[1,10], index: 2, kind: input, shape index: {}]   ;;  %s1010_s3 = inlined_call_operand.vmem [shape: f32[250,10], index: 3, kind: output, shape index: {}]  }
   0x1 LB: > { %s581_s13 = sadd.s32 4294967295, %s700_s12   ;;  %p585_p0 = scmp.ge.s32.totalorder %s700_s12, 1  ;;  %s700_s12 = sphi %s722_s12, %s13_s12  }
   0x2   : > { %p138_p1 = scmp.lt.s32.totalorder %s700_s12, 3 }
   0x4   : > { %p139_p2 = pnand %p585_p0, %p138_p1 }
   0x5   : > { %s586_s18 = sshll.u32 (!%p139_p2), %s581_s13, 4 }
   0x6   : > { %142 = sbr.rel (%p139_p2) target bundleno = 453 (0x1c5), region = 32  ;;  %p163_p3 = scmp.lt.s32.totalorder (!%p139_p2), %s586_s18, 31 }
   0xb   : > { %v193_v0 = vld [vmem:[%s1008_s1 + $0x18] sm:$0x3f]  ;;  %vm247_vm0 = vcmask 1045504   ;;  %v192_v1 = vld [vmem:[%s1008_s1 + $0x10] sm:$0xff]  ;;  %v191_v2 = vld [vmem:[%s1008_s1 + $0x8] sm:$0xff]  ;;  %s1012_s18 = smov (!%p163_p3, %s586_s18), 31 }
   0xc   : > { %590 = vmatpush.msk.msra.mxu0 %vm247_vm0, %v193_v0  ;;  %609 = vmatpush.msk.msra.mxu1 %vm247_vm0, %v193_v0  ;;  %v190_v3 = vld [vmem:[%s1008_s1] sm:$0xff]  ;;  %s587_s23 = sshll.u32 %s1012_s18, 3  ;;  %vm198_vm1 = vcmask 244736   ;;  %vm316_vm2 = vcmask 80896  }
   0xd   : > { %610 = vmatpush.msk.msra.mxu2 %vm247_vm0, %v193_v0  ;;  %611 = vmatpush.msk.msra.mxu3 %vm247_vm0, %v193_v0  ;;  %s750_s26 = scalar_lea.vmem %s1007_s0, %s587_s23  ;;  %v787_v20 = vld [vmem:[%s1009_s2] ss:$0 sm:$0xff]  ;;  %s954_s4 = scalar_lea.vmem %s1010_s3, %s587_s23 }
   0xe   : > { %264 = vmatpush.msra.mxu0 %v192_v1  ;;  %612 = vmatpush.msra.mxu1 %v192_v1  ;;  %v174_v4 = vld [vmem:[%s750_s26] sm:$0xff]  ;;  %v175_v8 = vld [vmem:[%s750_s26 + $0x8] sm:$0xff]  ;;  %v176_v12 = vld [vmem:[%s750_s26 + $0x10] sm:$0xff] }
   0xf   : > { %613 = vmatpush.msra.mxu2 %v192_v1  ;;  %614 = vmatpush.msra.mxu3 %v192_v1  ;;  %v178_v5 = vld [vmem:[%s750_s26 + $0x20] sm:$0xff]  ;;  %v183_v9 = vld [vmem:[%s750_s26 + $0x48] sm:$0xff]  ;;  %v184_v13 = vld [vmem:[%s750_s26 + $0x50] sm:$0xff] }
  0x10   : > { %265 = vmatpush.msra.mxu0 %v191_v2  ;;  %615 = vmatpush.msra.mxu1 %v191_v2  ;;  %v182_v6 = vld [vmem:[%s750_s26 + $0x40] sm:$0xff]  ;;  %v179_v10 = vld [vmem:[%s750_s26 + $0x28] sm:$0xff]  ;;  %v180_v14 = vld [vmem:[%s750_s26 + $0x30] sm:$0xff] }
  0x11   : > { %616 = vmatpush.msra.mxu2 %v191_v2  ;;  %617 = vmatpush.msra.mxu3 %v191_v2  ;;  %v186_v7 = vld [vmem:[%s750_s26 + $0x60] sm:$0xff]  ;;  %v187_v11 = vld [vmem:[%s750_s26 + $0x68] sm:$0xff]  ;;  %v188_v15 = vld [vmem:[%s750_s26 + $0x70] sm:$0xff] }
  0x12   : > { %266 = vmatpush.msra.mxu0 %v190_v3  ;;  %618 = vmatpush.msra.mxu1 %v190_v3  ;;  %v177_v16 = vld [vmem:[%s750_s26 + $0x18] sm:$0xff] }
  0x13   : > { %619 = vmatpush.msra.mxu2 %v190_v3  ;;  %591 = vmatmul.msk.f32.vlgmr.msra.gmra.mxu0 %vm198_vm1, %v174_v4  ;;  %v185_v17 = vld [vmem:[%s750_s26 + $0x58] sm:$0xff] }
  0x14   : > { %595 = vmatmul.msk.f32.vlgmr.msra.gmra.mxu1 %vm198_vm1, %v178_v5  ;;  %599 = vmatmul.msk.f32.vlgmr.msra.gmra.mxu2 %vm198_vm1, %v182_v6  ;;  %v181_v18 = vld [vmem:[%s750_s26 + $0x38] sm:$0xff] }
  0x15   : > { %620 = vmatpush.msra.mxu3 %v190_v3  ;;  %v189_v19 = vld [vmem:[%s750_s26 + $0x78] sm:$0xff] }
  0x16   : > { %603 = vmatmul.msk.f32.vlgmr.msra.gmra.mxu3 %vm198_vm1, %v186_v7 }
  0x1b   : > { %592 = vmatmul.msk.f32.gmra.mxu0 %vm198_vm1, %v175_v8 }
  0x1c   : > { %600 = vmatmul.msk.f32.gmra.mxu2 %vm198_vm1, %v183_v9  ;;  %596 = vmatmul.msk.f32.gmra.mxu1 %vm198_vm1, %v179_v10 }
  0x1e   : > { %604 = vmatmul.msk.f32.gmra.mxu3 %vm198_vm1, %v187_v11 }
  0x23   : > { %593 = vmatmul.msk.f32.gmra.mxu0 %vm198_vm1, %v176_v12 }
  0x24   : > { %601 = vmatmul.msk.f32.gmra.mxu2 %vm198_vm1, %v184_v13  ;;  %597 = vmatmul.msk.f32.gmra.mxu1 %vm198_vm1, %v180_v14 }
  0x26   : > { %605 = vmatmul.msk.f32.gmra.mxu3 %vm198_vm1, %v188_v15 }
  0x2b   : > { %594 = vmatmul.msk.f32.gmra.mxu0 %vm198_vm1, %v177_v16 }
  0x2c   : > { %602 = vmatmul.msk.f32.gmra.mxu2 %vm198_vm1, %v185_v17  ;;  %598 = vmatmul.msk.f32.gmra.mxu1 %vm198_vm1, %v181_v18 }
  0x2e   : > { %606 = vmatmul.msk.f32.gmra.mxu3 %vm198_vm1, %v189_v19 }
  0x90   : > { %v268_v21 = vpop.f32.mrf.mxu0 }
  0x91   : > { %v790_v22 = vadd.f32 %v787_v20, %v268_v21  ;;  %v280_v23 = vpop.f32.mrf.mxu1 }
  0x92   : > { %v793_v24 = vadd.f32 %v787_v20, %v280_v23 }
  0x93   : > { %v317_v25 = vsel %vm316_vm2, %v790_v22, -inf }
  0x94   : > { %v329_v26 = vsel %vm316_vm2, %v793_v24, -inf  ;;  %318 = vmax.xlane.f32.xlu0 %v317_v25 }
  0x95   : > { %330 = vmax.xlane.f32.xlu2 %v329_v26 }
  0x97   : > { %v292_v27 = vpop.f32.mrf.mxu2 }
  0x98   : > { %v800_v28 = vadd.f32 %v787_v20, %v292_v27  ;;  %v271_v29 = vpop.f32.mrf.mxu0 }
  0x99   : > { %v304_v30 = vpop.f32.mrf.mxu3  ;;  %v283_v33 = vpop.f32.mrf.mxu1  ;;  %v813_v37 = vadd.f32 %v787_v20, %v271_v29 }
  0x9a   : > { %v803_v31 = vadd.f32 %v787_v20, %v304_v30  ;;  %v341_v32 = vsel %vm316_vm2, %v800_v28, -inf  ;;  %v810_v35 = vadd.f32 %v787_v20, %v283_v33 }
  0x9b   : > { %v320_v43 = vsel %vm316_vm2, %v813_v37, -inf }
  0x9c   : > { %v353_v34 = vsel %vm316_vm2, %v803_v31, -inf  ;;  %v332_v41 = vsel %vm316_vm2, %v810_v35, -inf }
  0x9d   : > { %342 = vmax.xlane.f32.xlu2 %v341_v32  ;;  %354 = vmax.xlane.f32.xlu0 %v353_v34 }
  0x9f   : > { %v295_v36 = vpop.f32.mrf.mxu2 }
  0xa0   : > { %v274_v38 = vpop.f32.mrf.mxu0  ;;  %v825_v45 = vadd.f32 %v787_v20, %v295_v36 }
  0xa1   : > { %v816_v39 = vadd.f32 %v787_v20, %v274_v38  ;;  %v307_v40 = vpop.f32.mrf.mxu3  ;;  %v286_v47 = vpop.f32.mrf.mxu1 }
  0xa2   : > { %v344_v51 = vsel %vm316_vm2, %v825_v45, -inf  ;;  %v838_v53 = vadd.f32 %v787_v20, %v286_v47  ;;  %v865_v3 = vadd.f32 %v787_v20, %v307_v40 }
  0xa3   : > { %v323_v42 = vsel %vm316_vm2, %v816_v39, -inf }
  0xa4   : > { %324 = vmax.xlane.f32.xlu1 %v323_v42  ;;  %v335_v58 = vsel %vm316_vm2, %v838_v53, -inf  ;;  %v356_v4 = vsel %vm316_vm2, %v865_v3, -inf }
  0xa5   : > { %333 = vmax.xlane.f32.xlu2 %v332_v41  ;;  %321 = vmax.xlane.f32.xlu0 %v320_v43 }
  0xa7   : > { %v298_v44 = vpop.f32.mrf.mxu2 }
  0xa8   : > { %v828_v46 = vadd.f32 %v787_v20, %v298_v44  ;;  %v277_v50 = vpop.f32.mrf.mxu0 }
  0xa9   : > { %v310_v48 = vpop.f32.mrf.mxu3  ;;  %v835_v52 = vadd.f32 %v787_v20, %v277_v50  ;;  %v289_v59 = vpop.f32.mrf.mxu1 }
  0xaa   : > { %v347_v49 = vsel %vm316_vm2, %v828_v46, -inf  ;;  %v850_v61 = vadd.f32 %v787_v20, %v310_v48  ;;  %v853_v62 = vadd.f32 %v787_v20, %v289_v59 }
  0xab   : > { %v326_v56 = vsel %vm316_vm2, %v835_v52, -inf }
  0xac   : > { %348 = vmax.xlane.f32.xlu1 %v347_v49  ;;  %v359_v0 = vsel %vm316_vm2, %v850_v61, -inf  ;;  %v338_v1 = vsel %vm316_vm2, %v853_v62, -inf }
  0xad   : > { %345 = vmax.xlane.f32.xlu0 %v344_v51 }
  0xaf   : > { %v301_v54 = vpop.f32.mrf.mxu2 }
  0xb0   : > { %v841_v55 = vadd.f32 %v787_v20, %v301_v54 }
  0xb1   : > { %v313_v60 = vpop.f32.mrf.mxu3 }
  0xb2   : > { %v350_v57 = vsel %vm316_vm2, %v841_v55, -inf  ;;  %v856_v63 = vadd.f32 %v787_v20, %v313_v60 }
  0xb3   : > { %351 = vmax.xlane.f32.xlu2 %v350_v57 }
  0xb4   : > { %327 = vmax.xlane.f32.xlu1 %v326_v56  ;;  %v362_v2 = vsel %vm316_vm2, %v856_v63, -inf }
  0xb5   : > { %336 = vmax.xlane.f32.xlu0 %v335_v58 }
  0xbb   : > { %360 = vmax.xlane.f32.xlu2 %v359_v0 }
  0xbc   : > { %339 = vmax.xlane.f32.xlu1 %v338_v1 }
  0xbd   : > { %363 = vmax.xlane.f32.xlu0 %v362_v2 }
  0xc4   : > { %357 = vmax.xlane.f32.xlu1 %v356_v4 }
 0x107   : > { %v319_v5 = vpop.xlane.xlu0 %318 }
 0x108   : > { %v331_v6 = vpop.xlane.xlu2 %330  ;;  %v870_v7 = vsub.f32 %v790_v22, %v319_v5 }
 0x109   : > { %v873_v8 = vsub.f32 %v793_v24, %v331_v6 }
 0x10a   : > { %v381_v9 = vmul.f32 1.442695, %v870_v7 }
 0x10b   : > { %v389_v10 = vmul.f32 1.442695, %v873_v8 }
 0x10c   : > { %630 = vpow2.f32 %v381_v9 }
 0x10d   : > { %632 = vpow2.f32 %v389_v10 }
 0x110   : > { %v343_v11 = vpop.xlane.xlu2 %342  ;;  %v355_v12 = vpop.xlane.xlu0 %354 }
 0x111   : > { %v878_v13 = vsub.f32 %v800_v28, %v343_v11  ;;  %v881_v14 = vsub.f32 %v803_v31, %v355_v12 }
 0x112   : > { %v631_v15 = vpop.eup %630 }
 0x113   : > { %v633_v16 = vpop.eup %632  ;;  %v397_v17 = vmul.f32 1.442695, %v878_v13  ;;  %v405_v18 = vmul.f32 1.442695, %v881_v14  ;;  %v413_v19 = vsel %vm316_vm2, %v631_v15, 0.0 }
 0x114   : > { %v425_v20 = vsel %vm316_vm2, %v633_v16, 0.0  ;;  %414 = vadd.xlane.f32.xlu1 %v413_v19 }
 0x115   : > { %634 = vpow2.f32 %v397_v17  ;;  %426 = vadd.xlane.f32.xlu2 %v425_v20 }
 0x116   : > { %636 = vpow2.f32 %v405_v18 }
 0x117   : > { %v325_v21 = vpop.xlane.xlu1 %324 }
 0x118   : > { %v334_v22 = vpop.xlane.xlu2 %333  ;;  %v322_v23 = vpop.xlane.xlu0 %321  ;;  %v895_v28 = vsub.f32 %v816_v39, %v325_v21 }
 0x119   : > { %v888_v24 = vsub.f32 %v810_v35, %v334_v22  ;;  %v891_v25 = vsub.f32 %v813_v37, %v322_v23 }
 0x11a   : > { %v385_v33 = vmul.f32 1.442695, %v895_v28 }
 0x11b   : > { %v635_v26 = vpop.eup %634  ;;  %v391_v27 = vmul.f32 1.442695, %v888_v24  ;;  %v383_v29 = vmul.f32 1.442695, %v891_v25 }
 0x11c   : > { %v637_v30 = vpop.eup %636  ;;  %v437_v31 = vsel %vm316_vm2, %v635_v26, 0.0 }
 0x11d   : > { %638 = vpow2.f32 %v391_v27  ;;  %438 = vadd.xlane.f32.xlu0 %v437_v31  ;;  %v449_v32 = vsel %vm316_vm2, %v637_v30, 0.0 }
 0x11e   : > { %640 = vpow2.f32 %v383_v29  ;;  %450 = vadd.xlane.f32.xlu1 %v449_v32 }
 0x11f   : > { %v349_v34 = vpop.xlane.xlu1 %348  ;;  %642 = vpow2.f32 %v385_v33 }
 0x120   : > { %v902_v35 = vsub.f32 %v828_v46, %v349_v34  ;;  %v346_v36 = vpop.xlane.xlu0 %345 }
 0x121   : > { %v905_v37 = vsub.f32 %v825_v45, %v346_v36 }
 0x122   : > { %v401_v38 = vmul.f32 1.442695, %v902_v35 }
 0x123   : > { %v639_v39 = vpop.eup %638  ;;  %v399_v40 = vmul.f32 1.442695, %v905_v37 }
 0x124   : > { %v641_v41 = vpop.eup %640  ;;  %644 = vpow2.f32 %v401_v38  ;;  %v428_v42 = vsel %vm316_vm2, %v639_v39, 0.0 }
 0x125   : > { %646 = vpow2.f32 %v399_v40  ;;  %429 = vadd.xlane.f32.xlu0 %v428_v42  ;;  %v416_v43 = vsel %vm316_vm2, %v641_v41, 0.0  ;;  %v643_v48 = vpop.eup %642 }
 0x126   : > { %417 = vadd.xlane.f32.xlu2 %v416_v43  ;;  %v352_v44 = vpop.xlane.xlu2 %351 }
 0x127   : > { %v912_v46 = vsub.f32 %v841_v55, %v352_v44  ;;  %v328_v45 = vpop.xlane.xlu1 %327  ;;  %v419_v55 = vsel %vm316_vm2, %v643_v48, 0.0 }
 0x128   : > { %v337_v47 = vpop.xlane.xlu0 %336  ;;  %v919_v54 = vsub.f32 %v835_v52, %v328_v45 }
 0x129   : > { %v403_v49 = vmul.f32 1.442695, %v912_v46  ;;  %v916_v50 = vsub.f32 %v838_v53, %v337_v47 }
 0x12a   : > { %v645_v51 = vpop.eup %644  ;;  %v387_v53 = vmul.f32 1.442695, %v919_v54 }
 0x12b   : > { %v647_v56 = vpop.eup %646  ;;  %648 = vpow2.f32 %v403_v49  ;;  %v393_v57 = vmul.f32 1.442695, %v916_v50  ;;  %v443_v58 = vsel %vm316_vm2, %v645_v51, 0.0 }
 0x12c   : > { %v440_v59 = vsel %vm316_vm2, %v647_v56, 0.0 }
 0x12d   : > { %650 = vpow2.f32 %v393_v57  ;;  %420 = vadd.xlane.f32.xlu0 %v419_v55  ;;  %441 = vadd.xlane.f32.xlu1 %v440_v59 }
 0x12e   : > { %444 = vadd.xlane.f32.xlu2 %v443_v58  ;;  %v361_v60 = vpop.xlane.xlu2 %360  ;;  %652 = vpow2.f32 %v387_v53 }
 0x12f   : > { %v927_v52 = vsub.f32 %v850_v61, %v361_v60  ;;  %v340_v0 = vpop.xlane.xlu1 %339 }
 0x130   : > { %v930_v1 = vsub.f32 %v853_v62, %v340_v0  ;;  %v364_v2 = vpop.xlane.xlu0 %363 }
 0x131   : > { %v649_v4 = vpop.eup %648  ;;  %v409_v5 = vmul.f32 1.442695, %v927_v52  ;;  %v935_v10 = vsub.f32 %v856_v63, %v364_v2 }
 0x132   : > { %v395_v6 = vmul.f32 1.442695, %v930_v1  ;;  %v446_v61 = vsel %vm316_vm2, %v649_v4, 0.0 }
 0x133   : > { %v651_v9 = vpop.eup %650  ;;  %654 = vpow2.f32 %v409_v5  ;;  %v411_v62 = vmul.f32 1.442695, %v935_v10 }
 0x134   : > { %656 = vpow2.f32 %v395_v6  ;;  %v431_v11 = vsel %vm316_vm2, %v651_v9, 0.0  ;;  %v653_v15 = vpop.eup %652 }
 0x135   : > { %447 = vadd.xlane.f32.xlu0 %v446_v61  ;;  %432 = vadd.xlane.f32.xlu1 %v431_v11  ;;  %658 = vpow2.f32 %v411_v62  ;;  %v422_v21 = vsel %vm316_vm2, %v653_v15, 0.0 }
 0x137   : > { %v358_v12 = vpop.xlane.xlu1 %357 }
 0x138   : > { %v941_v16 = vsub.f32 %v865_v3, %v358_v12 }
 0x139   : > { %v655_v17 = vpop.eup %654 }
 0x13a   : > { %v657_v18 = vpop.eup %656  ;;  %v407_v19 = vmul.f32 1.442695, %v941_v16  ;;  %v455_v20 = vsel %vm316_vm2, %v655_v17, 0.0 }
 0x13b   : > { %v434_v63 = vsel %vm316_vm2, %v657_v18, 0.0  ;;  %v659_v22 = vpop.eup %658 }
 0x13c   : > { %660 = vpow2.f32 %v407_v19  ;;  %435 = vadd.xlane.f32.xlu2 %v434_v63  ;;  %v458_v26 = vsel %vm316_vm2, %v659_v22, 0.0 }
 0x13d   : > { %456 = vadd.xlane.f32.xlu0 %v455_v20  ;;  %423 = vadd.xlane.f32.xlu1 %v422_v21 }
 0x142   : > { %v661_v23 = vpop.eup %660 }
 0x143   : > { %v452_v3 = vsel %vm316_vm2, %v661_v23, 0.0 }
 0x144   : > { %453 = vadd.xlane.f32.xlu2 %v452_v3 }
 0x145   : > { %459 = vadd.xlane.f32.xlu1 %v458_v26 }
 0x187   : > { %v415_v27 = vpop.xlane.xlu1 %414 }
 0x188   : > { %v427_v29 = vpop.xlane.xlu2 %426  ;;  %662 = vlog2.f32 %v415_v27 }
 0x189   : > { %664 = vlog2.f32 %v427_v29 }
 0x18e   : > { %v663_v30 = vpop.eup %662 }
 0x18f   : > { %v665_v31 = vpop.eup %664  ;;  %v462_v32 = vmul.f32 0.6931472, %v663_v30 }
 0x190   : > { %v470_v33 = vmul.f32 0.6931472, %v665_v31  ;;  %v439_v34 = vpop.xlane.xlu0 %438 }
 0x191   : > { %v493_v36 = vsub.f32 %v870_v7, %v462_v32  ;;  %v451_v38 = vpop.xlane.xlu1 %450  ;;  %666 = vlog2.f32 %v439_v34 }
 0x192   : > { %v497_v39 = vsub.f32 %v873_v8, %v470_v33  ;;  %668 = vlog2.f32 %v451_v38 }
 0x193   : > { %509 = vst.msk [vmem:[%s954_s4] sm:$0xff] %vm316_vm2, %v493_v36 }
 0x194   : > { %513 = vst.msk [vmem:[%s954_s4 + $0x20] sm:$0xff] %vm316_vm2, %v497_v39 }
 0x197   : > { %v667_v40 = vpop.eup %666 }
 0x198   : > { %v669_v41 = vpop.eup %668  ;;  %v478_v42 = vmul.f32 0.6931472, %v667_v40  ;;  %v430_v43 = vpop.xlane.xlu0 %429 }
 0x199   : > { %v486_v44 = vmul.f32 0.6931472, %v669_v41  ;;  %v418_v45 = vpop.xlane.xlu2 %417  ;;  %670 = vlog2.f32 %v430_v43 }
 0x19a   : > { %v501_v7 = vsub.f32 %v878_v13, %v478_v42  ;;  %672 = vlog2.f32 %v418_v45 }
 0x19b   : > { %v505_v47 = vsub.f32 %v881_v14, %v486_v44 }
 0x19c   : > { %517 = vst.msk [vmem:[%s954_s4 + $0x40] sm:$0xff] %vm316_vm2, %v501_v7 }
 0x19d   : > { %521 = vst.msk [vmem:[%s954_s4 + $0x60] sm:$0xff] %vm316_vm2, %v505_v47 }
 0x19f   : > { %v671_v8 = vpop.eup %670 }
 0x1a0   : > { %v673_v48 = vpop.eup %672  ;;  %v472_v49 = vmul.f32 0.6931472, %v671_v8  ;;  %v442_v51 = vpop.xlane.xlu1 %441 }
 0x1a1   : > { %v421_v56 = vpop.xlane.xlu0 %420  ;;  %v464_v57 = vmul.f32 0.6931472, %v673_v48  ;;  %v445_v58 = vpop.xlane.xlu2 %444  ;;  %674 = vlog2.f32 %v442_v51 }
 0x1a2   : > { %v498_v55 = vsub.f32 %v888_v24, %v472_v49  ;;  %676 = vlog2.f32 %v445_v58 }
 0x1a3   : > { %v494_v13 = vsub.f32 %v891_v25, %v464_v57  ;;  %678 = vlog2.f32 %v421_v56 }
 0x1a4   : > { %514 = vst.msk [vmem:[%s954_s4 + $0x28] sm:$0xff] %vm316_vm2, %v498_v55 }
 0x1a5   : > { %510 = vst.msk [vmem:[%s954_s4 + $0x8] sm:$0xff] %vm316_vm2, %v494_v13 }
 0x1a7   : > { %v675_v14 = vpop.eup %674 }
 0x1a8   : > { %v677_v59 = vpop.eup %676  ;;  %v480_v53 = vmul.f32 0.6931472, %v675_v14  ;;  %v433_v60 = vpop.xlane.xlu1 %432 }
 0x1a9   : > { %v448_v0 = vpop.xlane.xlu0 %447  ;;  %v679_v2 = vpop.eup %678  ;;  %v482_v4 = vmul.f32 0.6931472, %v677_v59  ;;  %680 = vlog2.f32 %v433_v60 }
 0x1aa   : > { %v502_v24 = vsub.f32 %v905_v37, %v480_v53  ;;  %v466_v5 = vmul.f32 0.6931472, %v679_v2  ;;  %682 = vlog2.f32 %v448_v0 }
 0x1ab   : > { %v503_v25 = vsub.f32 %v902_v35, %v482_v4 }
 0x1ac   : > { %518 = vst.msk [vmem:[%s954_s4 + $0x48] sm:$0xff] %vm316_vm2, %v502_v24  ;;  %v495_v6 = vsub.f32 %v895_v28, %v466_v5 }
 0x1ad   : > { %519 = vst.msk [vmem:[%s954_s4 + $0x50] sm:$0xff] %vm316_vm2, %v503_v25 }
 0x1ae   : > { %511 = vst.msk [vmem:[%s954_s4 + $0x10] sm:$0xff] %vm316_vm2, %v495_v6 }
 0x1af   : > { %v681_v9 = vpop.eup %680  ;;  %v436_v61 = vpop.xlane.xlu2 %435 }
 0x1b0   : > { %v683_v11 = vpop.eup %682  ;;  %v474_v62 = vmul.f32 0.6931472, %v681_v9  ;;  %684 = vlog2.f32 %v436_v61  ;;  %v424_v37 = vpop.xlane.xlu1 %423 }
 0x1b1   : > { %v457_v12 = vpop.xlane.xlu0 %456  ;;  %v484_v15 = vmul.f32 0.6931472, %v683_v11  ;;  %686 = vlog2.f32 %v424_v37 }
 0x1b2   : > { %v499_v35 = vsub.f32 %v916_v50, %v474_v62  ;;  %688 = vlog2.f32 %v457_v12 }
 0x1b3   : > { %v504_v28 = vsub.f32 %v912_v46, %v484_v15 }
 0x1b4   : > { %515 = vst.msk [vmem:[%s954_s4 + $0x30] sm:$0xff] %vm316_vm2, %v499_v35 }
 0x1b5   : > { %520 = vst.msk [vmem:[%s954_s4 + $0x58] sm:$0xff] %vm316_vm2, %v504_v28 }
 0x1b6   : > { %v685_v17 = vpop.eup %684 }
 0x1b7   : > { %v687_v18 = vpop.eup %686  ;;  %v476_v19 = vmul.f32 0.6931472, %v685_v17  ;;  %v454_v63 = vpop.xlane.xlu2 %453 }
 0x1b8   : > { %v689_v20 = vpop.eup %688  ;;  %v468_v21 = vmul.f32 0.6931472, %v687_v18  ;;  %690 = vlog2.f32 %v454_v63  ;;  %v460_v22 = vpop.xlane.xlu1 %459 }
 0x1b9   : > { %v500_v50 = vsub.f32 %v930_v1, %v476_v19  ;;  %v490_v23 = vmul.f32 0.6931472, %v689_v20  ;;  %692 = vlog2.f32 %v460_v22 }
 0x1ba   : > { %v496_v46 = vsub.f32 %v919_v54, %v468_v21 }
 0x1bb   : > { %516 = vst.msk [vmem:[%s954_s4 + $0x38] sm:$0xff] %vm316_vm2, %v500_v50  ;;  %v507_v3 = vsub.f32 %v927_v52, %v490_v23 }
 0x1bc   : > { %512 = vst.msk [vmem:[%s954_s4 + $0x18] sm:$0xff] %vm316_vm2, %v496_v46 }
 0x1bd   : > { %523 = vst.msk [vmem:[%s954_s4 + $0x70] sm:$0xff] %vm316_vm2, %v507_v3 }
 0x1be   : > { %v691_v26 = vpop.eup %690 }
 0x1bf   : > { %v693_v27 = vpop.eup %692  ;;  %v488_v29 = vmul.f32 0.6931472, %v691_v26 }
 0x1c0   : > { %v492_v30 = vmul.f32 0.6931472, %v693_v27 }
 0x1c1   : > { %v506_v31 = vsub.f32 %v941_v16, %v488_v29 }
 0x1c2   : > { %v508_v1 = vsub.f32 %v935_v10, %v492_v30 }
 0x1c3   : > { %522 = vst.msk [vmem:[%s954_s4 + $0x68] sm:$0xff] %vm316_vm2, %v506_v31 }
 0x1c4   : > { %524 = vst.msk [vmem:[%s954_s4 + $0x78] sm:$0xff] %vm316_vm2, %v508_v1 }
 0x1c5 PF: > { %s13_s12 = sadd.s32 1, %s700_s12  }
 0x1c6   : > { %p10_p4 = scmp.ge.s32.totalorder %s13_s12, 4  }
 0x1c8   :  { %12 = sbr.rel (!%p10_p4) target bundleno = 1 (0x1), region = 62 }

</bundles_post_ra>
